<compile_context>
chip_gen: v6e
topology: v6e:2x2x1
jax: 0.10.0
libtpu: 0.0.40
codegen_flags: <defaults>
</compile_context>

<pallas_src>
import jax
import jax.numpy as jnp
from jax.experimental import pallas as pl
from jax.experimental.pallas import tpu as pltpu


_VMEM_CAP_BYTES = 56 * 1024 * 1024  # leave headroom under v7x's 64 MiB physical per-TC


def mlp_kernel(x_ref, w1_ref, b1_ref, w2_ref, b2_ref, h_ref, y_ref):
    mxu_dt = w1_ref.dtype  # bf16 if weights were prepared, else the raw weight dtype

    # fc1: (tb, dims) @ (dims, 128) -> (tb, 128), f32 accumulate on the MXU.
    h = jnp.dot(x_ref[...].astype(mxu_dt), w1_ref[...],
                preferred_element_type=jnp.float32)
    h = jax.nn.sigmoid(h + b1_ref[...])        # f32 bias add (VPU) + sigmoid (EUP slot)
    h_ref[...] = h.astype(h_ref.dtype)

    # fc2: (tb, 128) @ (128, dims) -> (tb, dims).
    y = jnp.dot(h.astype(mxu_dt), w2_ref[...],
                preferred_element_type=jnp.float32)
    y_ref[...] = (y + b2_ref[...]).astype(y_ref.dtype)


def prepare_mlp_params(w1, b1, w2, b2, *, mxu_dtype=jnp.bfloat16):
    """One-time (load-time) cast of the MXU operands; biases stay f32.

    Hoists the weight cast out of the per-call hot path so repeated forward calls
    do not re-read / re-write the weights in HBM through separate XLA ops.
    """
    return (w1.astype(mxu_dtype), b1.astype(jnp.float32),
            w2.astype(mxu_dtype), b2.astype(jnp.float32))


def _vmem_bytes(tb, dims, hidden, x_isz, out_isz, w_isz):
    x_b = 2 * tb * dims * x_isz          # x stream, double-buffered
    h_b = 2 * tb * hidden * out_isz      # h output, double-buffered
    y_b = 2 * tb * dims * out_isz        # y output, double-buffered
    w_b = 2 * dims * hidden * w_isz      # W1 + W2, single-buffered (Buffered(1))
    b_b = (hidden + dims) * 4
    return x_b + h_b + y_b + w_b + b_b


def two_layer_mlp(x, w1, b1, w2, b2, *, tb=None, out_dtype=None, core_parallel=False):
    """x: (B, dims); w1: (dims, 128); b1: (1, 128); w2: (128, dims); b2: (1, dims)."""
    B, dims = x.shape
    hidden = w1.shape[1]  # 128
    out_dtype = x.dtype if out_dtype is None else out_dtype

    x_isz = jnp.dtype(x.dtype).itemsize
    w_isz = jnp.dtype(w1.dtype).itemsize
    out_isz = jnp.dtype(out_dtype).itemsize

    if tb is None:
        # HBM-bound: size the batch tile so each grid step moves ~2 MiB on the dominant
        # per-row stream (amortizes the ~0.35 us per-step overhead), then clamp by batch
        # size and the VMEM budget below.
        row_bytes = dims * max(x_isz, out_isz)
        tb = max(256, (2 << 20) // max(row_bytes, 1))
        tb = min(tb, 2048)
    tb = min(tb, B)
    if tb != B:
        tb = max(8, (tb // 8) * 8)       # sublane-aligned tiles when tiling the batch
    while tb > 8 and _vmem_bytes(tb, dims, hidden, x_isz, out_isz, w_isz) > _VMEM_CAP_BYTES:
        tb = max(8, tb // 2)

    grid = (pl.cdiv(B, tb),)             # ragged last block is fine: rows are independent
    vmem_limit = int(min(
        _VMEM_CAP_BYTES,
        max(2 * _vmem_bytes(tb, dims, hidden, x_isz, out_isz, w_isz), 16 << 20)))

    def resident(shape):
        # Grid-invariant operand: fetched once, no double-buffering.
        return pl.BlockSpec(shape, lambda i: (0, 0), pipeline_mode=pl.Buffered(1))

    batch_sem = pltpu.CORE_PARALLEL if core_parallel else "parallel"

    h, y = pl.pallas_call(
        mlp_kernel,
        out_shape=(
            jax.ShapeDtypeStruct((B, hidden), out_dtype),   # sigmoid(fc1(x))
            jax.ShapeDtypeStruct((B, dims), out_dtype),     # fc2(sigmoid(fc1(x)))
        ),
        grid_spec=pltpu.PrefetchScalarGridSpec(
            num_scalar_prefetch=0,
            grid=grid,
            in_specs=[
                pl.BlockSpec((tb, dims), lambda i: (i, 0)),   # x tile (streamed)
                resident((dims, hidden)),                      # W1
                resident((1, hidden)),                         # b1
                resident((hidden, dims)),                      # W2
                resident((1, dims)),                           # b2
            ],
            out_specs=[
                pl.BlockSpec((tb, hidden), lambda i: (i, 0)),
                pl.BlockSpec((tb, dims), lambda i: (i, 0)),
            ],
        ),
        compiler_params=pltpu.CompilerParams(
            dimension_semantics=(batch_sem,),
            vmem_limit_bytes=vmem_limit,
        ),
    )(x, w1, b1, w2, b2)
    return h, y


if __name__ == "__main__":
    # Small shapes consistent with the module: batch=16, dims=64, hidden=128.
    B, DIMS, HIDDEN = 16, 64, 128
    key = jax.random.PRNGKey(0)
    kx, kw1, kb1, kw2, kb2 = jax.random.split(key, 5)

    x = jax.random.normal(kx, (B, DIMS), dtype=jnp.float32)
    # Deterministic parameter init (synthetic; not loaded from a checkpoint).
    w1 = jax.random.normal(kw1, (DIMS, HIDDEN), dtype=jnp.float32) * 0.05
    b1 = jax.random.normal(kb1, (1, HIDDEN), dtype=jnp.float32) * 0.05
    w2 = jax.random.normal(kw2, (HIDDEN, DIMS), dtype=jnp.float32) * 0.05
    b2 = jax.random.normal(kb2, (1, DIMS), dtype=jnp.float32) * 0.05

    # One-time weight preparation (bf16 MXU operands), hoisted out of the per-call path.
    w1c, b1c, w2c, b2c = prepare_mlp_params(w1, b1, w2, b2)

    h, y = two_layer_mlp(x, w1c, b1c, w2c, b2c)   # tb clamps to B -> grid=(1,)
    jax.block_until_ready((h, y))

    # Reference: same math as the PyTorch forward, in f32. Kernel uses bf16 MXU operands
    # with f32 accumulation, so compare at a bf16-appropriate tolerance.
    h_ref = jax.nn.sigmoid(x @ w1 + b1)
    y_ref = h_ref @ w2 + b2
    assert h.shape == (B, HIDDEN) and y.shape == (B, DIMS)
    assert jnp.allclose(h, h_ref, atol=1e-2, rtol=1e-2), "fc1/sigmoid mismatch"
    assert jnp.allclose(y, y_ref, atol=1e-2, rtol=1e-2), "fc2 mismatch"

    print("KERNEL_OK")
</pallas_src>

<mosaic_0001>
module attributes {stable_mosaic.version = 11 : i64} {
  func.func @mlp_kernel(%arg0: i32, %arg1: memref<16x64xf32, #tpu.memory_space<vmem>>, %arg2: memref<64x128xbf16, #tpu.memory_space<vmem>>, %arg3: memref<1x128xf32, #tpu.memory_space<vmem>>, %arg4: memref<128x64xbf16, #tpu.memory_space<vmem>>, %arg5: memref<1x64xf32, #tpu.memory_space<vmem>>, %arg6: memref<16x128xf32, #tpu.memory_space<vmem>>, %arg7: memref<16x64xf32, #tpu.memory_space<vmem>>) attributes {dimension_semantics = [#tpu.dimension_semantics<parallel>], iteration_bounds = array<i64: 1>, scalar_prefetch = 0 : i64, scratch_operands = 0 : i64, tpu.core_type = #tpu.core_type<tc>, window_params = [{transform_indices = @transform_0, window_bounds = array<i64: 16, 64>}, {pipeline_mode = #tpu.pipeline_mode<synchronous>, transform_indices = @transform_1, window_bounds = array<i64: 64, 128>}, {pipeline_mode = #tpu.pipeline_mode<synchronous>, transform_indices = @transform_2, window_bounds = array<i64: 1, 128>}, {pipeline_mode = #tpu.pipeline_mode<synchronous>, transform_indices = @transform_3, window_bounds = array<i64: 128, 64>}, {pipeline_mode = #tpu.pipeline_mode<synchronous>, transform_indices = @transform_4, window_bounds = array<i64: 1, 64>}, {transform_indices = @transform_5, window_bounds = array<i64: 16, 128>}, {transform_indices = @transform_6, window_bounds = array<i64: 16, 64>}]} {
    %c0 = arith.constant 0 : index
    %c0_0 = arith.constant 0 : index
    %0 = vector.load %arg1[%c0, %c0_0] : memref<16x64xf32, #tpu.memory_space<vmem>>, vector<16x64xf32>
    %1 = arith.truncf %0 : vector<16x64xf32> to vector<16x64xbf16>
    %c0_1 = arith.constant 0 : index
    %c0_2 = arith.constant 0 : index
    %2 = vector.load %arg2[%c0_1, %c0_2] : memref<64x128xbf16, #tpu.memory_space<vmem>>, vector<64x128xbf16>
    %cst = arith.constant dense<0.000000e+00> : vector<16x128xf32>
    %3 = tpu.matmul %1, %2, %cst {dimension_numbers = #tpu.dot_dimension_numbers<[1], [0], [0], [1], [0, 0, 1, 1], [], []>} : vector<16x64xbf16>, vector<64x128xbf16>, vector<16x128xf32> -> vector<16x128xf32>
    %c0_3 = arith.constant 0 : index
    %c0_4 = arith.constant 0 : index
    %4 = vector.load %arg3[%c0_3, %c0_4] : memref<1x128xf32, #tpu.memory_space<vmem>>, vector<1x128xf32>
    %5 = vector.broadcast %4 : vector<1x128xf32> to vector<16x128xf32>
    %6 = arith.addf %3, %5 : vector<16x128xf32>
    %7 = arith.negf %6 : vector<16x128xf32>
    %8 = math.exp %7 : vector<16x128xf32>
    %cst_5 = arith.constant 1.000000e+00 : f32
    %9 = vector.broadcast %cst_5 : f32 to vector<16x128xf32>
    %10 = arith.addf %9, %8 : vector<16x128xf32>
    %11 = arith.divf %9, %10 : vector<16x128xf32>
    %c0_6 = arith.constant 0 : index
    %c0_7 = arith.constant 0 : index
    %12 = vector.load %arg6[%c0_6, %c0_7] : memref<16x128xf32, #tpu.memory_space<vmem>>, vector<16x128xf32>
    tpu.vector_store %arg6[%c0_6, %c0_7], %11 {strides = array<i32>} : memref<16x128xf32, #tpu.memory_space<vmem>>, vector<16x128xf32>,
    %13 = arith.truncf %11 : vector<16x128xf32> to vector<16x128xbf16>
    %c0_8 = arith.constant 0 : index
    %c0_9 = arith.constant 0 : index
    %14 = vector.load %arg4[%c0_8, %c0_9] : memref<128x64xbf16, #tpu.memory_space<vmem>>, vector<128x64xbf16>
    %cst_10 = arith.constant dense<0.000000e+00> : vector<16x64xf32>
    %15 = tpu.matmul %13, %14, %cst_10 {dimension_numbers = #tpu.dot_dimension_numbers<[1], [0], [0], [1], [0, 0, 1, 1], [], []>} : vector<16x128xbf16>, vector<128x64xbf16>, vector<16x64xf32> -> vector<16x64xf32>
    %c0_11 = arith.constant 0 : index
    %c0_12 = arith.constant 0 : index
    %16 = vector.load %arg5[%c0_11, %c0_12] : memref<1x64xf32, #tpu.memory_space<vmem>>, vector<1x64xf32>
    %17 = vector.broadcast %16 : vector<1x64xf32> to vector<16x64xf32>
    %18 = arith.addf %15, %17 : vector<16x64xf32>
    %c0_13 = arith.constant 0 : index
    %c0_14 = arith.constant 0 : index
    %19 = vector.load %arg7[%c0_13, %c0_14] : memref<16x64xf32, #tpu.memory_space<vmem>>, vector<16x64xf32>
    tpu.vector_store %arg7[%c0_13, %c0_14], %18 {strides = array<i32>} : memref<16x64xf32, #tpu.memory_space<vmem>>, vector<16x64xf32>,
    return
  }
  func.func @transform_0(%arg0: i32) -> (i32, i32) {
    %c0_i32 = arith.constant 0 : i32
    %c0_i32_0 = arith.constant 0 : i32
    return %arg0, %c0_i32 : i32, i32
  }
  func.func @transform_1(%arg0: i32) -> (i32, i32) {
    %c0_i32 = arith.constant 0 : i32
    %c0_i32_0 = arith.constant 0 : i32
    %c0_i32_1 = arith.constant 0 : i32
    return %c0_i32, %c0_i32_0 : i32, i32
  }
  func.func @transform_2(%arg0: i32) -> (i32, i32) {
    %c0_i32 = arith.constant 0 : i32
    %c0_i32_0 = arith.constant 0 : i32
    %c0_i32_1 = arith.constant 0 : i32
    return %c0_i32, %c0_i32_0 : i32, i32
  }
  func.func @transform_3(%arg0: i32) -> (i32, i32) {
    %c0_i32 = arith.constant 0 : i32
    %c0_i32_0 = arith.constant 0 : i32
    %c0_i32_1 = arith.constant 0 : i32
    return %c0_i32, %c0_i32_0 : i32, i32
  }
  func.func @transform_4(%arg0: i32) -> (i32, i32) {
    %c0_i32 = arith.constant 0 : i32
    %c0_i32_0 = arith.constant 0 : i32
    %c0_i32_1 = arith.constant 0 : i32
    return %c0_i32, %c0_i32_0 : i32, i32
  }
  func.func @transform_5(%arg0: i32) -> (i32, i32) {
    %c0_i32 = arith.constant 0 : i32
    %c0_i32_0 = arith.constant 0 : i32
    return %arg0, %c0_i32 : i32, i32
  }
  func.func @transform_6(%arg0: i32) -> (i32, i32) {
    %c0_i32 = arith.constant 0 : i32
    %c0_i32_0 = arith.constant 0 : i32
    return %arg0, %c0_i32 : i32, i32
  }
}

</mosaic_0001>

<bundles_post_ra>
// kernel: tpu_custom_call.1
= control target key start
LH: loop header
LB: loop body
LE: loop exit
PB: predicated region body
PF: predicated region fallthrough
CT: control target
= control target key end

     0   :  { %12 = vsyncpa [#allocation3], 0  ;;  %v406_v1 = vmov 0.0   ;;  %vm407_vm0 = vmmov 0   ;;  %s504_s0 = inlined_call_operand.vmem [shape: f32[16,64], index: 0, kind: input, shape index: {}]   ;;  %s505_s1 = inlined_call_operand.vmem [shape: bf16[64,128], index: 1, kind: input, shape index: {}]   ;;  %s506_s2 = inlined_call_operand.vmem [shape: f32[1,128], index: 2, kind: input, shape index: {}]   ;;  %s507_s3 = inlined_call_operand.vmem [shape: bf16[128,64], index: 3, kind: input, shape index: {}]   ;;  %s508_s4 = inlined_call_operand.vmem [shape: f32[1,64], index: 4, kind: input, shape index: {}]   ;;  %s509_s5 = inlined_call_operand.hbm [shape: f32[16,128], index: 5, kind: output, shape index: {0}]   ;;  %s510_s6 = inlined_call_operand.hbm [shape: f32[16,64], index: 6, kind: output, shape index: {1}]  }
   0x1   :  { %v342_v0 = vld [vmem:[%s505_s1 + $0x18] sm:$0xff]   ;;  %304 = vmatprep.subr.bf16.mxu0 %v406_v1  ;;  %316 = vmatprep.subr.bf16.mxu1 %v406_v1  ;;  %v343_v2 = vld [vmem:[%s505_s1 + $0x10] sm:$0xff]   ;;  %v344_v3 = vld [vmem:[%s505_s1 + $0x8] sm:$0xff]  }
   0x2   :  { %305 = vmatpush3.bf16.msra.mxu0 %v342_v0  ;;  %312 = vmatprep.mubr.msk.bf16.mxu0 %vm407_vm0, %v406_v1  ;;  %v345_v4 = vld [vmem:[%s505_s1] sm:$0xff]   ;;  %v26_v6 = vld [vmem:[%s504_s0 + $0x8] sm:$0xff] }
   0x3   :  { %306 = vmatprep.subr.bf16.mxu0 %v406_v1  ;;  %332 = vmatprep.mubr.msk.bf16.mxu1 %vm407_vm0, %v406_v1  ;;  %v25_v5 = vld [vmem:[%s504_s0] sm:$0xff] }
   0x6   :  { %307 = vmatpush3.bf16.msra.mxu0 %v343_v2 }
   0x7   :  { %308 = vmatprep.subr.bf16.mxu0 %v406_v1 }
   0xa   :  { %309 = vmatpush3.bf16.msra.mxu0 %v344_v3 }
   0xb   :  { %13 = vsyncpa [#allocation5], 0  ;;  %310 = vmatprep.subr.bf16.mxu0 %v406_v1  ;;  %v27_v7 = vpack.c.bf16 %v26_v6, %v25_v5  ;;  %vm67_vm1 = vcmask 523264   ;;  %v346_v8 = vld [vmem:[%s507_s3 + $0x38] sm:$0xff]   ;;  %v347_v9 = vld [vmem:[%s507_s3 + $0x30] sm:$0xff]  }
   0xc   :  { %317 = vmatpush3.bf16.msra.mxu1 %v346_v8  ;;  %v348_v10 = vld [vmem:[%s507_s3 + $0x28] sm:$0xff]   ;;  %v349_v11 = vld [vmem:[%s507_s3 + $0x20] sm:$0xff]   ;;  %v350_v12 = vld [vmem:[%s507_s3 + $0x18] sm:$0xff]  }
   0xd   :  { %318 = vmatprep.subr.bf16.mxu1 %v406_v1  ;;  %v351_v13 = vld [vmem:[%s507_s3 + $0x10] sm:$0xff]   ;;  %v352_v14 = vld [vmem:[%s507_s3 + $0x8] sm:$0xff]   ;;  %v353_v15 = vld [vmem:[%s507_s3] sm:$0xff]  }
   0xe   :  { %311 = vmatpush3.bf16.msra.mxu0 %v345_v4  ;;  %v273_v16 = vld [vmem:[%s506_s2] ss:$0 sm:$0xff]  ;;  %s408_s2 = smov [#allocation2]  }
   0xf   :  { %s246_s3 = sshll.u32 %s408_s2, 4  ;;  %s247_s3 = int_to_ptr.vmem [resolvable:$true] %s246_s3 }
  0x10   :  { %319 = vmatpush3.bf16.msra.mxu1 %v347_v9  ;;  %s362_s25 = scalar_lea.vmem %s247_s3, 256  ;;  %p367_p1 = scmp.lt.s32.totalorder %s247_s3, %s247_s3 }
  0x11   :  { %313 = vmatmul.mubr.msk.bf16.vlgmr.msra.gmra.mxu0 %vm67_vm1, %v27_v7  ;;  %320 = vmatprep.subr.bf16.mxu1 %v406_v1  ;;  %p363_p0 = scmp.ne.s32.totalorder %s247_s3, %s362_s25  ;;  %p368_p2 = scmp.lt.s32.totalorder %s362_s25, %s362_s25 }
  0x13   :  { %p369_p3 = por %p368_p2, %p367_p1 }
  0x14   :  { %321 = vmatpush3.bf16.msra.mxu1 %v348_v10 }
  0x15   :  { %322 = vmatprep.subr.bf16.mxu1 %v406_v1  ;;  %p370_p4 = pnand %p369_p3, %p363_p0 }
  0x18   :  { %323 = vmatpush3.bf16.msra.mxu1 %v349_v11 }
  0x19   :  { %324 = vmatprep.subr.bf16.mxu1 %v406_v1 }
  0x1c   :  { %325 = vmatpush3.bf16.msra.mxu1 %v350_v12 }
  0x1d   :  { %326 = vmatprep.subr.bf16.mxu1 %v406_v1 }
  0x20   :  { %327 = vmatpush3.bf16.msra.mxu1 %v351_v13 }
  0x21   :  { %328 = vmatprep.subr.bf16.mxu1 %v406_v1 }
  0x24   :  { %329 = vmatpush3.bf16.msra.mxu1 %v352_v14 }
  0x25   :  { %330 = vmatprep.subr.bf16.mxu1 %v406_v1 }
  0x28   :  { %331 = vmatpush3.bf16.msra.mxu1 %v353_v15 }
  0xd1   :  { %v105_v17 = vpop.f32.mrf.mxu0 }
  0xd2   :  { %v106_v18 = vadd.f32 %v273_v16, %v105_v17 }
  0xd3   :  { %v314_v19 = vpop.f32.mrf.mxu0 }
  0xd4   :  { %v279_v20 = vmul.f32 -1.442695, %v106_v18 }
  0xd5   :  { %v108_v21 = vpop.f32.mrf.mxu0 }
  0xd6   :  { %354 = vpow2.f32 %v279_v20  ;;  %v109_v22 = vadd.f32 %v273_v16, %v108_v21 }
  0xd7   :  { %v315_v23 = vpop.f32.mrf.mxu0 }
  0xd8   :  { %v280_v24 = vmul.f32 -1.442695, %v109_v22 }
  0xda   :  { %356 = vpow2.f32 %v280_v24 }
  0xe3   :  { %v355_v25 = vpop.eup %354 }
  0xe4   :  { %v118_v26 = vadd.f32 1.0, %v355_v25 }
  0xe6   :  { %358 = vrcp.f32 %v118_v26 }
  0xe7   :  { %v357_v27 = vpop.eup %356 }
  0xe8   :  { %v119_v28 = vadd.f32 1.0, %v357_v27 }
  0xea   :  { %360 = vrcp.f32 %v119_v28 }
  0xf3   :  { %v359_v29 = vpop.eup %358 }
  0xf4   :  { %124 = vst [vmem:[#allocation2] sm:$0xff] %v359_v29 }
  0xf7   :  { %v361_v30 = vpop.eup %360 }
  0xf8   :  { %125 = vst [vmem:[#allocation2 + $0x8] sm:$0xff] %v361_v30  ;;  %v126_v31 = vpack.c.bf16 %v361_v30, %v359_v29 }
  0xfa   :  { %333 = vmatmul.mubr.bf16.vlgmr.msra.gmra.mxu1 %v126_v31 }
  0xfb   :  { %373 = shalt.err (!%p370_p4)
}
  0xfc   :  { %s409_s26 = smov 128   ;;  %s410_s27 = smov 8   ;;  %v281_v32 = vld [vmem:[%s508_s4] ss:$0 sm:$0xff] }
  0xfd   :  { %252 = dma.vmem_to_hbm [thread:$0]  %s247_s3, 256, %s509_s5, [#allocation3], %s409_s26, %s409_s26, %s410_s27  }
  0xfe   :  { %s411_s8 = smov [#allocation4]  }
  0xff   :  { %s258_s9 = sshll.u32 %s411_s8, 4  ;;  %s259_s9 = int_to_ptr.vmem [resolvable:$true] %s258_s9 }
 0x100   :  { %s382_s10 = scalar_lea.vmem %s259_s9, 256  ;;  %p387_p6 = scmp.lt.s32.totalorder %s259_s9, %s259_s9 }
 0x101   :  { %p383_p5 = scmp.ne.s32.totalorder %s259_s9, %s382_s10  ;;  %p388_p7 = scmp.lt.s32.totalorder %s382_s10, %s382_s10 }
 0x103   :  { %p389_p8 = por %p388_p7, %p387_p6 }
 0x105   :  { %p390_p9 = pnand %p389_p8, %p383_p5 }
 0x1ba   :  { %v232_v33 = vpop.f32.mrf.mxu1 }
 0x1bb   :  { %v233_v34 = vadd.f32 %v281_v32, %v232_v33 }
 0x1bc   :  { %v334_v35 = vpop.f32.mrf.mxu1 }
 0x1bd   :  { %239 = vst.msk [vmem:[#allocation4] sm:$0xff] %vm67_vm1, %v233_v34 }
 0x1be   :  { %v235_v36 = vpop.f32.mrf.mxu1 }
 0x1bf   :  { %v236_v37 = vadd.f32 %v281_v32, %v235_v36 }
 0x1c0   :  { %v335_v38 = vpop.f32.mrf.mxu1 }
 0x1c1   :  { %240 = vst.msk [vmem:[#allocation4 + $0x8] sm:$0xff] %vm67_vm1, %v236_v37 }
 0x1c2   :  { %393 = shalt.err (!%p390_p9)
}
 0x1c3   :  { %264 = dma.vmem_to_hbm [thread:$0]  %s259_s9, 256, %s510_s6, [#allocation5], %s409_s26, %s409_s26, %s410_s27  }
 0x1c4   :  { %402 = dma.done.wait [#allocation3], 256  }
 0x1c5   :  { %403 = vsyncadd [#allocation3], 4294967040 }
 0x1c6   :  { %404 = dma.done.wait [#allocation5], 256  }
 0x1c7   :  { %405 = vsyncadd [#allocation5], 4294967040 }
 0x1c8   :  { %271 = vsyncpa [#allocation3], 1 }
 0x1c9   :  { %272 = vsyncpa [#allocation5], 1 }

</bundles_post_ra>
